<compile_context>
chip_gen: v7x
topology: tpu7x:2x2x1
jax: 0.10.0
libtpu: 0.0.40
codegen_flags: <defaults>
</compile_context>

<pallas_src>
from functools import partial

import numpy as np
import jax
import jax.numpy as jnp
from jax import lax
from jax.experimental import pallas as pl
from jax.experimental.pallas import tpu as pltpu

IGNORE_LABEL = -1
THRESH = 0.8
MIN_KEPT = 50            # module default is 100000; small so OHEM is exercised

_LANE = 128              # TPU lane width
_TR_TARGET = 256         # sublane rows per pixel tile -> 256*128 = 32768 px
_NUM_PROBES = 8          # candidates per k-th-smallest search pass
_NUM_SELECT_PASSES = 13  # enough to pin down the ~2^30 wide f32-bit range
_ONE_BITS = 0x3F800000   # f32 bit pattern of 1.0 (softmax prob upper bound)


# ----------------------------------------------------------------------------
# Kernel A: per-pixel cross entropy + true-class softmax probability.
#   loss[n] = logsumexp_c(score[c,n]) - score[target[n],n]
#   p[n]    = exp(-loss[n])                      (softmax prob of target class)
# Ignored / padded pixels get p = +inf so they never pass `p < threshold`
# (loss is left as-is; it is never selected, so no masking work is spent).
# ----------------------------------------------------------------------------
def _pixel_kernel(score_ref, target_ref, out_ref, *, ignore_label):
    # score_ref: (1, C, TR, 128)  input dtype; target_ref: (1, TR, 128) int32
    # out_ref:   (1, 2, TR, 128) f32  -- plane 0 = loss, plane 1 = p
    s = score_ref[0].astype(jnp.float32)           # (C, TR, 128)
    t = target_ref[0]                              # (TR, 128)

    m = jnp.max(s, axis=0)                                         # (TR, 128)
    lse = m + jnp.log(jnp.sum(jnp.exp(s - m[None]), axis=0))       # (TR, 128)

    tmp_t = jnp.where(t == ignore_label, 0, t)                     # (TR, 128)
    cls = lax.broadcasted_iota(jnp.int32, s.shape, 0)              # (C, TR, 128)
    s_t = jnp.sum(jnp.where(cls == tmp_t[None], s, 0.0), axis=0)   # (TR, 128)

    loss = lse - s_t
    p = jnp.exp(-loss)                                             # reuse loss (EUP)
    valid = t != ignore_label

    out_ref[0, 0] = loss
    out_ref[0, 1] = jnp.where(valid, p, jnp.inf)


# ----------------------------------------------------------------------------
# Kernel C: per-image count of p <= candidate_j for NUM_PROBES candidates.
# Accumulates into a resident (1, 128) output block across the tile axis
# (lane j holds count for candidate j).
# ----------------------------------------------------------------------------
def _count_kernel(cand_ref, p_ref, cnt_ref):
    # cand_ref: (1, 1, NP) f32 ; p_ref: (1, 1, TR, 128) f32 ; cnt_ref: (1, 1, 128) f32
    @pl.when(pl.program_id(1) == 0)
    def _():
        cnt_ref[...] = jnp.zeros_like(cnt_ref)

    p = p_ref[0, 0]                    # (TR, 128)
    cand = cand_ref[0]                 # (1, NP)
    lane = lax.broadcasted_iota(jnp.int32, (1, _LANE), 1)
    acc = jnp.zeros((1, _LANE), jnp.float32)
    for j in range(_NUM_PROBES):       # static unroll, small
        cj = cand[:, j:j + 1]          # (1, 1) -> broadcast compare
        cnt_j = jnp.sum((p <= cj).astype(jnp.float32))
        acc = acc + jnp.where(lane == j, cnt_j, 0.0)
    cnt_ref[0] += acc


# ----------------------------------------------------------------------------
# Kernel B: per-image masked/thresholded sum & count of the pixel losses,
# accumulated across pixel tiles (lane 0 = sum, lane 1 = count).
# ----------------------------------------------------------------------------
def _reduce_kernel(lp_ref, thr_ref, out_ref):
    # lp_ref: (1, 2, TR, 128) f32 ; thr_ref: (1, 1, 1) f32 ; out_ref: (1, 1, 128) f32
    @pl.when(pl.program_id(1) == 0)
    def _():
        out_ref[...] = jnp.zeros_like(out_ref)

    loss = lp_ref[0, 0]                # (TR, 128)
    p = lp_ref[0, 1]                   # (TR, 128)
    thr = thr_ref[0]                   # (1, 1)
    sel = p < thr                      # ignored/padded pixels have p=+inf
    s = jnp.sum(jnp.where(sel, loss, 0.0))
    c = jnp.sum(sel.astype(jnp.float32))
    lane = lax.broadcasted_iota(jnp.int32, (1, _LANE), 1)
    out_ref[0] += jnp.where(lane == 0, s, 0.0) + jnp.where(lane == 1, c, 0.0)


def _round_up(x, m):
    return (x + m - 1) // m * m


def ohem_cross_entropy_per_image(score, target, *, ignore_label=-1,
                                 thresh=0.8, min_kept=100000):
    B, C, H, W = score.shape
    # TODO(synk): F.upsample (bilinear) resize of `score` when its spatial size
    # differs from `target` is not implemented; shapes must match.
    assert target.shape == (B, H, W)
    min_kept = max(1, min_kept)
    N = H * W

    # --- lane-dense relayout: pixels -> (R, 128) planes, padded to whole tiles.
    TR = min(_TR_TARGET, pl.cdiv(N, _LANE))
    n_pad = _round_up(N, TR * _LANE)
    R = n_pad // _LANE
    n_tiles = R // TR

    score_r = score.reshape(B, C, N)                 # keep producer dtype
    target_r = target.reshape(B, N).astype(jnp.int32)
    if n_pad != N:
        # padded pixels are marked ignore -> they never enter any statistic
        score_r = jnp.pad(score_r, ((0, 0), (0, 0), (0, n_pad - N)))
        target_r = jnp.pad(target_r, ((0, 0), (0, n_pad - N)),
                           constant_values=ignore_label)
    score_r = score_r.reshape(B, C, R, _LANE)
    target_r = target_r.reshape(B, R, _LANE)

    itemsize = jnp.dtype(score_r.dtype).itemsize
    tile_bytes = (C * TR * _LANE * itemsize      # score tile
                  + TR * _LANE * 4               # target tile
                  + 2 * TR * _LANE * 4)          # packed loss/p tile
    vmem_limit = int(min(max(4 * tile_bytes + (8 << 20), 16 << 20), 64 << 20))

    # --- Kernel A: per-pixel loss + true-class prob, packed (B, 2, R, 128) ---
    lossp = pl.pallas_call(
        partial(_pixel_kernel, ignore_label=ignore_label),
        out_shape=jax.ShapeDtypeStruct((B, 2, R, _LANE), jnp.float32),
        grid=(B, n_tiles),
        in_specs=[pl.BlockSpec((1, C, TR, _LANE), lambda b, t: (b, 0, t, 0)),
                  pl.BlockSpec((1, TR, _LANE), lambda b, t: (b, t, 0))],
        out_specs=pl.BlockSpec((1, 2, TR, _LANE), lambda b, t: (b, 0, t, 0)),
        compiler_params=pltpu.CompilerParams(
            dimension_semantics=("parallel", "parallel"),
            vmem_limit_bytes=vmem_limit),
    )(score_r, target_r)

    # --- OHEM threshold: exact k-th smallest valid p via bit-space bisection.
    n_valid = jnp.sum((target_r != ignore_label).astype(jnp.int32), axis=(1, 2))
    K = (jnp.minimum(jnp.int32(min_kept), jnp.maximum(n_valid - 1, 0)) + 1
         ).astype(jnp.float32)                                      # rank, 1-based

    count_call = pl.pallas_call(
        _count_kernel,
        out_shape=jax.ShapeDtypeStruct((B, 1, _LANE), jnp.float32),
        grid=(B, n_tiles),
        in_specs=[pl.BlockSpec((1, 1, _NUM_PROBES), lambda b, t: (b, 0, 0)),
                  pl.BlockSpec((1, 1, TR, _LANE), lambda b, t: (b, 1, t, 0))],
        out_specs=pl.BlockSpec((1, 1, _LANE), lambda b, t: (b, 0, 0)),
        compiler_params=pltpu.CompilerParams(
            dimension_semantics=("parallel", "arbitrary"),
            vmem_limit_bytes=vmem_limit),
    )

    probe_idx = jnp.arange(_NUM_PROBES, dtype=jnp.int32)

    def select_pass(_, carry):
        lo, hi = carry                                   # (B,) int32 each
        span = hi - lo
        step = jnp.maximum(span // _NUM_PROBES, 1)
        probes = jnp.minimum(lo[:, None] + step[:, None] * probe_idx[None, :],
                             hi[:, None])                # (B, NP) bit patterns
        cand = lax.bitcast_convert_type(probes, jnp.float32)
        counts = count_call(cand.reshape(B, 1, _NUM_PROBES),
                            lossp)[:, 0, :_NUM_PROBES]   # (B, NP)
        ge = counts >= K[:, None]
        exists = jnp.any(ge, axis=1)
        jstar = jnp.argmax(ge, axis=1).astype(jnp.int32)
        q_j = jnp.take_along_axis(probes, jstar[:, None], axis=1)[:, 0]
        q_prev = jnp.take_along_axis(probes,
                                     jnp.maximum(jstar - 1, 0)[:, None],
                                     axis=1)[:, 0]
        new_hi = jnp.where(exists, q_j, hi)
        new_lo = jnp.where(exists,
                           jnp.where(jstar == 0, q_j, q_prev + 1),
                           probes[:, -1] + 1)
        return new_lo, new_hi

    lo0 = jnp.zeros((B,), jnp.int32)
    hi0 = jnp.full((B,), _ONE_BITS, jnp.int32)
    lo, hi = lax.fori_loop(0, _NUM_SELECT_PASSES, select_pass, (lo0, hi0))
    kth = lax.bitcast_convert_type(lo, jnp.float32)      # exact k-th smallest p
    threshold = jnp.maximum(kth, jnp.float32(thresh)).reshape(B, 1, 1)

    # --- Kernel B: per-image thresholded sum / count -------------------------
    per_image = pl.pallas_call(
        _reduce_kernel,
        out_shape=jax.ShapeDtypeStruct((B, 1, _LANE), jnp.float32),
        grid=(B, n_tiles),
        in_specs=[pl.BlockSpec((1, 2, TR, _LANE), lambda b, t: (b, 0, t, 0)),
                  pl.BlockSpec((1, 1, 1), lambda b, t: (b, 0, 0))],
        out_specs=pl.BlockSpec((1, 1, _LANE), lambda b, t: (b, 0, 0)),
        compiler_params=pltpu.CompilerParams(
            dimension_semantics=("parallel", "arbitrary"),
            vmem_limit_bytes=vmem_limit),
    )(lossp, threshold)

    sums = per_image[:, 0, 0]
    cnts = per_image[:, 0, 1]
    # NOTE: cnts can be 0 (empty selection / no valid pixels) -> NaN, matching
    # torch's mean() of an empty tensor in the reference module.
    return jnp.sum(sums / cnts) / B


# ----------------------------------------------------------------------------
# Pure NumPy reference following the PyTorch module line by line.
# ----------------------------------------------------------------------------
def _reference(score, target, ignore_label, thresh, min_kept):
    score = np.asarray(score, np.float64)
    target = np.asarray(target)
    B, C, H, W = score.shape
    m = score.max(axis=1, keepdims=True)
    e = np.exp(score - m)
    pred = e / e.sum(axis=1, keepdims=True)
    logp = (score - m) - np.log(e.sum(axis=1, keepdims=True))
    tmp_t = np.where(target == ignore_label, 0, target)
    idx = tmp_t[:, None, :, :]
    p_true = np.take_along_axis(pred, idx, axis=1)[:, 0].reshape(B, -1)
    lp_true = np.take_along_axis(logp, idx, axis=1)[:, 0].reshape(B, -1)
    pixel_losses = np.where(target.reshape(B, -1) == ignore_label, 0.0, -lp_true)
    mask = target.reshape(B, -1) != ignore_label
    min_kept = max(1, min_kept)
    losses = 0.0
    for i in range(B):
        pv = p_true[i][mask[i]]
        lv = pixel_losses[i][mask[i]]
        order = np.argsort(pv)
        pv_s, lv_s = pv[order], lv[order]
        kk = min(min_kept, pv.size - 1)
        threshold = max(pv_s[kk], thresh)
        losses += lv_s[pv_s < threshold].mean()
    return np.float32(losses / B)


if __name__ == "__main__":
    key = jax.random.PRNGKey(0)
    k1, k2, k3 = jax.random.split(key, 3)

    B, C, H, W = 2, 4, 16, 16
    score = jax.random.normal(k1, (B, C, H, W), dtype=jnp.float32) * 2.0
    target = jax.random.randint(k2, (B, H, W), 0, C).astype(jnp.int32)
    ignore_mask = jax.random.bernoulli(k3, 0.1, (B, H, W))
    target = jnp.where(ignore_mask, jnp.int32(IGNORE_LABEL), target)

    fn = jax.jit(partial(ohem_cross_entropy_per_image,
                         ignore_label=IGNORE_LABEL, thresh=THRESH,
                         min_kept=MIN_KEPT))
    out = fn(score, target)
    out = jax.block_until_ready(out)

    ref = _reference(score, target, IGNORE_LABEL, THRESH, MIN_KEPT)
    np.testing.assert_allclose(np.float32(out), ref, rtol=1e-4, atol=1e-5)

    print("KERNEL_OK")
</pallas_src>

<mosaic_0001>
module attributes {stable_mosaic.version = 11 : i64} {
  func.func @_pixel_kernel(%arg0: i32, %arg1: i32, %arg2: memref<1x4x2x128xf32, #tpu.memory_space<vmem>>, %arg3: memref<1x2x128xi32, #tpu.memory_space<vmem>>, %arg4: memref<1x2x2x128xf32, #tpu.memory_space<vmem>>) attributes {dimension_semantics = [#tpu.dimension_semantics<parallel>, #tpu.dimension_semantics<parallel>], iteration_bounds = array<i64: 2, 1>, scalar_prefetch = 0 : i64, scratch_operands = 0 : i64, tpu.core_type = #tpu.core_type<tc>, window_params = [{transform_indices = @transform_0, window_bounds = array<i64: 1, 4, 2, 128>}, {transform_indices = @transform_1, window_bounds = array<i64: 1, 2, 128>}, {transform_indices = @transform_2, window_bounds = array<i64: 1, 2, 2, 128>}]} {
    %c0 = arith.constant 0 : index
    %c0_0 = arith.constant 0 : index
    %c0_1 = arith.constant 0 : index
    %c0_2 = arith.constant 0 : index
    %0 = vector.load %arg2[%c0, %c0_0, %c0_1, %c0_2] : memref<1x4x2x128xf32, #tpu.memory_space<vmem>>, vector<1x4x2x128xf32>
    %1 = vector.shape_cast %0 : vector<1x4x2x128xf32> to vector<4x2x128xf32>
    %c0_3 = arith.constant 0 : index
    %c0_4 = arith.constant 0 : index
    %c0_5 = arith.constant 0 : index
    %2 = vector.load %arg3[%c0_3, %c0_4, %c0_5] : memref<1x2x128xi32, #tpu.memory_space<vmem>>, vector<1x2x128xi32>
    %3 = vector.shape_cast %2 : vector<1x2x128xi32> to vector<2x128xi32>
    %cst = arith.constant dense<0xFF800000> : vector<2x128xf32>
    %4 = vector.multi_reduction <maximumf>, %1, %cst [0] : vector<4x2x128xf32> to vector<2x128xf32>
    %5 = vector.shape_cast %4 : vector<2x128xf32> to vector<1x2x128xf32>
    %6 = vector.broadcast %5 : vector<1x2x128xf32> to vector<4x2x128xf32>
    %7 = arith.subf %1, %6 : vector<4x2x128xf32>
    %8 = math.exp %7 : vector<4x2x128xf32>
    %cst_6 = arith.constant dense<0.000000e+00> : vector<2x128xf32>
    %9 = vector.multi_reduction <add>, %8, %cst_6 [0] : vector<4x2x128xf32> to vector<2x128xf32>
    %10 = math.log %9 : vector<2x128xf32>
    %11 = arith.addf %4, %10 : vector<2x128xf32>
    %c-1_i32 = arith.constant -1 : i32
    %12 = vector.broadcast %c-1_i32 : i32 to vector<2x128xi32>
    %13 = arith.cmpi eq, %3, %12 : vector<2x128xi32>
    %c0_i32 = arith.constant 0 : i32
    %14 = vector.broadcast %c0_i32 : i32 to vector<2x128xi32>
    %15 = arith.select %13, %14, %3 : vector<2x128xi1>, vector<2x128xi32>
    %16 = tpu.iota {dimensions = array<i32: 0>} : vector<4x2x128xi32>
    %17 = vector.shape_cast %15 : vector<2x128xi32> to vector<1x2x128xi32>
    %18 = vector.broadcast %17 : vector<1x2x128xi32> to vector<4x2x128xi32>
    %19 = arith.cmpi eq, %16, %18 : vector<4x2x128xi32>
    %cst_7 = arith.constant 0.000000e+00 : f32
    %20 = vector.broadcast %cst_7 : f32 to vector<4x2x128xf32>
    %21 = arith.select %19, %1, %20 : vector<4x2x128xi1>, vector<4x2x128xf32>
    %cst_8 = arith.constant dense<0.000000e+00> : vector<2x128xf32>
    %22 = vector.multi_reduction <add>, %21, %cst_8 [0] : vector<4x2x128xf32> to vector<2x128xf32>
    %23 = arith.subf %11, %22 : vector<2x128xf32>
    %cst_9 = arith.constant 0.000000e+00 : f32
    %24 = vector.broadcast %cst_9 : f32 to vector<2x128xf32>
    %25 = arith.subf %24, %23 : vector<2x128xf32>
    %26 = math.exp %25 : vector<2x128xf32>
    %c-1_i32_10 = arith.constant -1 : i32
    %27 = vector.broadcast %c-1_i32_10 : i32 to vector<2x128xi32>
    %28 = arith.cmpi ne, %3, %27 : vector<2x128xi32>
    %c0_11 = arith.constant 0 : index
    %c0_12 = arith.constant 0 : index
    %c0_13 = arith.constant 0 : index
    %c0_14 = arith.constant 0 : index
    %29 = vector.load %arg4[%c0_11, %c0_12, %c0_13, %c0_14] : memref<1x2x2x128xf32, #tpu.memory_space<vmem>>, vector<1x1x2x128xf32>
    %30 = vector.shape_cast %29 : vector<1x1x2x128xf32> to vector<2x128xf32>
    %31 = vector.shape_cast %23 : vector<2x128xf32> to vector<1x1x2x128xf32>
    tpu.vector_store %arg4[%c0_11, %c0_12, %c0_13, %c0_14], %31 {strides = array<i32>} : memref<1x2x2x128xf32, #tpu.memory_space<vmem>>, vector<1x1x2x128xf32>,
    %cst_15 = arith.constant 0x7F800000 : f32
    %32 = vector.broadcast %cst_15 : f32 to vector<2x128xf32>
    %33 = arith.select %28, %26, %32 : vector<2x128xi1>, vector<2x128xf32>
    %c0_16 = arith.constant 0 : index
    %c1 = arith.constant 1 : index
    %c0_17 = arith.constant 0 : index
    %c0_18 = arith.constant 0 : index
    %34 = vector.load %arg4[%c0_16, %c1, %c0_17, %c0_18] : memref<1x2x2x128xf32, #tpu.memory_space<vmem>>, vector<1x1x2x128xf32>
    %35 = vector.shape_cast %34 : vector<1x1x2x128xf32> to vector<2x128xf32>
    %36 = vector.shape_cast %33 : vector<2x128xf32> to vector<1x1x2x128xf32>
    tpu.vector_store %arg4[%c0_16, %c1, %c0_17, %c0_18], %36 {strides = array<i32>} : memref<1x2x2x128xf32, #tpu.memory_space<vmem>>, vector<1x1x2x128xf32>,
    return
  }
  func.func @transform_0(%arg0: i32, %arg1: i32) -> (i32, i32, i32, i32) {
    %c0_i32 = arith.constant 0 : i32
    %c0_i32_0 = arith.constant 0 : i32
    %c0_i32_1 = arith.constant 0 : i32
    return %arg0, %c0_i32, %arg1, %c0_i32_0 : i32, i32, i32, i32
  }
  func.func @transform_1(%arg0: i32, %arg1: i32) -> (i32, i32, i32) {
    %c0_i32 = arith.constant 0 : i32
    %c0_i32_0 = arith.constant 0 : i32
    return %arg0, %arg1, %c0_i32 : i32, i32, i32
  }
  func.func @transform_2(%arg0: i32, %arg1: i32) -> (i32, i32, i32, i32) {
    %c0_i32 = arith.constant 0 : i32
    %c0_i32_0 = arith.constant 0 : i32
    %c0_i32_1 = arith.constant 0 : i32
    return %arg0, %c0_i32, %arg1, %c0_i32_0 : i32, i32, i32, i32
  }
}

module attributes {stable_mosaic.version = 11 : i64} {
  func.func @_count_kernel(%arg0: i32, %arg1: i32, %arg2: memref<1x1x8xf32, #tpu.memory_space<vmem>>, %arg3: memref<1x1x2x128xf32, #tpu.memory_space<vmem>>, %arg4: memref<1x1x128xf32, #tpu.memory_space<vmem>>) attributes {dimension_semantics = [#tpu.dimension_semantics<parallel>, #tpu.dimension_semantics<arbitrary>], iteration_bounds = array<i64: 2, 1>, scalar_prefetch = 0 : i64, scratch_operands = 0 : i64, tpu.core_type = #tpu.core_type<tc>, window_params = [{transform_indices = @transform_0, window_bounds = array<i64: 1, 1, 8>}, {transform_indices = @transform_1, window_bounds = array<i64: 1, 1, 2, 128>}, {transform_indices = @transform_2, window_bounds = array<i64: 1, 1, 128>}]} {
    %c0_i32 = arith.constant 0 : i32
    %0 = arith.cmpi eq, %arg1, %c0_i32 : i32
    %1 = arith.extui %0 : i1 to i32
    %c0_i32_0 = arith.constant 0 : i32
    %2 = arith.cmpi ne, %1, %c0_i32_0 : i32
    scf.if %2 {
      %cst_30 = arith.constant 0.000000e+00 : f32
      %135 = vector.broadcast %cst_30 : f32 to vector<1x1x128xf32>
      %c0_31 = arith.constant 0 : index
      %c0_32 = arith.constant 0 : index
      %c0_33 = arith.constant 0 : index
      %136 = vector.load %arg4[%c0_31, %c0_32, %c0_33] : memref<1x1x128xf32, #tpu.memory_space<vmem>>, vector<1x1x128xf32>
      tpu.vector_store %arg4[%c0_31, %c0_32, %c0_33], %135 {strides = array<i32>} : memref<1x1x128xf32, #tpu.memory_space<vmem>>, vector<1x1x128xf32>,
    } else {
    }
    %c0 = arith.constant 0 : index
    %c0_1 = arith.constant 0 : index
    %c0_2 = arith.constant 0 : index
    %c0_3 = arith.constant 0 : index
    %3 = vector.load %arg3[%c0, %c0_1, %c0_2, %c0_3] : memref<1x1x2x128xf32, #tpu.memory_space<vmem>>, vector<1x1x2x128xf32>
    %4 = vector.shape_cast %3 : vector<1x1x2x128xf32> to vector<2x128xf32>
    %c0_4 = arith.constant 0 : index
    %c0_5 = arith.constant 0 : index
    %c0_6 = arith.constant 0 : index
    %5 = vector.load %arg2[%c0_4, %c0_5, %c0_6] : memref<1x1x8xf32, #tpu.memory_space<vmem>>, vector<1x1x8xf32>
    %6 = vector.shape_cast %5 : vector<1x1x8xf32> to vector<1x8xf32>
    %7 = tpu.iota {dimensions = array<i32: 1>} : vector<1x128xi32>
    %cst = arith.constant 0.000000e+00 : f32
    %8 = vector.broadcast %cst : f32 to vector<1x128xf32>
    %9 = vector.extract_strided_slice %6 {offsets = [0, 0], sizes = [1, 1], strides = [1, 1]} : vector<1x8xf32> to vector<1x1xf32>
    %10 = vector.broadcast %9 : vector<1x1xf32> to vector<2x128xf32>
    %11 = arith.cmpf ole, %4, %10 : vector<2x128xf32>
    %12 = arith.extui %11 : vector<2x128xi1> to vector<2x128xi32>
    %13 = arith.sitofp %12 : vector<2x128xi32> to vector<2x128xf32>
    %14 = vector.shape_cast %13 : vector<2x128xf32> to vector<1x2x128xf32>
    %cst_7 = arith.constant dense<0.000000e+00> : vector<1xf32>
    %15 = vector.multi_reduction <add>, %14, %cst_7 [1, 2] : vector<1x2x128xf32> to vector<1xf32>
    %16 = vector.shape_cast %15 : vector<1xf32> to vector<1x1x1xf32>
    %17 = vector.extract %16[0, 0, 0] : f32 from vector<1x1x1xf32>
    %c0_i32_8 = arith.constant 0 : i32
    %18 = vector.broadcast %c0_i32_8 : i32 to vector<1x128xi32>
    %19 = arith.cmpi eq, %7, %18 : vector<1x128xi32>
    %cst_9 = arith.constant 0.000000e+00 : f32
    %20 = vector.broadcast %17 : f32 to vector<1x128xf32>
    %21 = vector.broadcast %cst_9 : f32 to vector<1x128xf32>
    %22 = arith.select %19, %20, %21 : vector<1x128xi1>, vector<1x128xf32>
    %23 = arith.addf %8, %22 : vector<1x128xf32>
    %24 = vector.extract_strided_slice %6 {offsets = [0, 1], sizes = [1, 1], strides = [1, 1]} : vector<1x8xf32> to vector<1x1xf32>
    %25 = vector.broadcast %24 : vector<1x1xf32> to vector<2x128xf32>
    %26 = arith.cmpf ole, %4, %25 : vector<2x128xf32>
    %27 = arith.extui %26 : vector<2x128xi1> to vector<2x128xi32>
    %28 = arith.sitofp %27 : vector<2x128xi32> to vector<2x128xf32>
    %29 = vector.shape_cast %28 : vector<2x128xf32> to vector<1x2x128xf32>
    %cst_10 = arith.constant dense<0.000000e+00> : vector<1xf32>
    %30 = vector.multi_reduction <add>, %29, %cst_10 [1, 2] : vector<1x2x128xf32> to vector<1xf32>
    %31 = vector.shape_cast %30 : vector<1xf32> to vector<1x1x1xf32>
    %32 = vector.extract %31[0, 0, 0] : f32 from vector<1x1x1xf32>
    %c1_i32 = arith.constant 1 : i32
    %33 = vector.broadcast %c1_i32 : i32 to vector<1x128xi32>
    %34 = arith.cmpi eq, %7, %33 : vector<1x128xi32>
    %cst_11 = arith.constant 0.000000e+00 : f32
    %35 = vector.broadcast %32 : f32 to vector<1x128xf32>
    %36 = vector.broadcast %cst_11 : f32 to vector<1x128xf32>
    %37 = arith.select %34, %35, %36 : vector<1x128xi1>, vector<1x128xf32>
    %38 = arith.addf %23, %37 : vector<1x128xf32>
    %39 = vector.extract_strided_slice %6 {offsets = [0, 2], sizes = [1, 1], strides = [1, 1]} : vector<1x8xf32> to vector<1x1xf32>
    %40 = vector.broadcast %39 : vector<1x1xf32> to vector<2x128xf32>
    %41 = arith.cmpf ole, %4, %40 : vector<2x128xf32>
    %42 = arith.extui %41 : vector<2x128xi1> to vector<2x128xi32>
    %43 = arith.sitofp %42 : vector<2x128xi32> to vector<2x128xf32>
    %44 = vector.shape_cast %43 : vector<2x128xf32> to vector<1x2x128xf32>
    %cst_12 = arith.constant dense<0.000000e+00> : vector<1xf32>
    %45 = vector.multi_reduction <add>, %44, %cst_12 [1, 2] : vector<1x2x128xf32> to vector<1xf32>
    %46 = vector.shape_cast %45 : vector<1xf32> to vector<1x1x1xf32>
    %47 = vector.extract %46[0, 0, 0] : f32 from vector<1x1x1xf32>
    %c2_i32 = arith.constant 2 : i32
    %48 = vector.broadcast %c2_i32 : i32 to vector<1x128xi32>
    %49 = arith.cmpi eq, %7, %48 : vector<1x128xi32>
    %cst_13 = arith.constant 0.000000e+00 : f32
    %50 = vector.broadcast %47 : f32 to vector<1x128xf32>
    %51 = vector.broadcast %cst_13 : f32 to vector<1x128xf32>
    %52 = arith.select %49, %50, %51 : vector<1x128xi1>, vector<1x128xf32>
    %53 = arith.addf %38, %52 : vector<1x128xf32>
    %54 = vector.extract_strided_slice %6 {offsets = [0, 3], sizes = [1, 1], strides = [1, 1]} : vector<1x8xf32> to vector<1x1xf32>
    %55 = vector.broadcast %54 : vector<1x1xf32> to vector<2x128xf32>
    %56 = arith.cmpf ole, %4, %55 : vector<2x128xf32>
    %57 = arith.extui %56 : vector<2x128xi1> to vector<2x128xi32>
    %58 = arith.sitofp %57 : vector<2x128xi32> to vector<2x128xf32>
    %59 = vector.shape_cast %58 : vector<2x128xf32> to vector<1x2x128xf32>
    %cst_14 = arith.constant dense<0.000000e+00> : vector<1xf32>
    %60 = vector.multi_reduction <add>, %59, %cst_14 [1, 2] : vector<1x2x128xf32> to vector<1xf32>
    %61 = vector.shape_cast %60 : vector<1xf32> to vector<1x1x1xf32>
    %62 = vector.extract %61[0, 0, 0] : f32 from vector<1x1x1xf32>
    %c3_i32 = arith.constant 3 : i32
    %63 = vector.broadcast %c3_i32 : i32 to vector<1x128xi32>
    %64 = arith.cmpi eq, %7, %63 : vector<1x128xi32>
    %cst_15 = arith.constant 0.000000e+00 : f32
    %65 = vector.broadcast %62 : f32 to vector<1x128xf32>
    %66 = vector.broadcast %cst_15 : f32 to vector<1x128xf32>
    %67 = arith.select %64, %65, %66 : vector<1x128xi1>, vector<1x128xf32>
    %68 = arith.addf %53, %67 : vector<1x128xf32>
    %69 = vector.extract_strided_slice %6 {offsets = [0, 4], sizes = [1, 1], strides = [1, 1]} : vector<1x8xf32> to vector<1x1xf32>
    %70 = vector.broadcast %69 : vector<1x1xf32> to vector<2x128xf32>
    %71 = arith.cmpf ole, %4, %70 : vector<2x128xf32>
    %72 = arith.extui %71 : vector<2x128xi1> to vector<2x128xi32>
    %73 = arith.sitofp %72 : vector<2x128xi32> to vector<2x128xf32>
    %74 = vector.shape_cast %73 : vector<2x128xf32> to vector<1x2x128xf32>
    %cst_16 = arith.constant dense<0.000000e+00> : vector<1xf32>
    %75 = vector.multi_reduction <add>, %74, %cst_16 [1, 2] : vector<1x2x128xf32> to vector<1xf32>
    %76 = vector.shape_cast %75 : vector<1xf32> to vector<1x1x1xf32>
    %77 = vector.extract %76[0, 0, 0] : f32 from vector<1x1x1xf32>
    %c4_i32 = arith.constant 4 : i32
    %78 = vector.broadcast %c4_i32 : i32 to vector<1x128xi32>
    %79 = arith.cmpi eq, %7, %78 : vector<1x128xi32>
    %cst_17 = arith.constant 0.000000e+00 : f32
    %80 = vector.broadcast %77 : f32 to vector<1x128xf32>
    %81 = vector.broadcast %cst_17 : f32 to vector<1x128xf32>
    %82 = arith.select %79, %80, %81 : vector<1x128xi1>, vector<1x128xf32>
    %83 = arith.addf %68, %82 : vector<1x128xf32>
    %84 = vector.extract_strided_slice %6 {offsets = [0, 5], sizes = [1, 1], strides = [1, 1]} : vector<1x8xf32> to vector<1x1xf32>
    %85 = vector.broadcast %84 : vector<1x1xf32> to vector<2x128xf32>
    %86 = arith.cmpf ole, %4, %85 : vector<2x128xf32>
    %87 = arith.extui %86 : vector<2x128xi1> to vector<2x128xi32>
    %88 = arith.sitofp %87 : vector<2x128xi32> to vector<2x128xf32>
    %89 = vector.shape_cast %88 : vector<2x128xf32> to vector<1x2x128xf32>
    %cst_18 = arith.constant dense<0.000000e+00> : vector<1xf32>
    %90 = vector.multi_reduction <add>, %89, %cst_18 [1, 2] : vector<1x2x128xf32> to vector<1xf32>
    %91 = vector.shape_cast %90 : vector<1xf32> to vector<1x1x1xf32>
    %92 = vector.extract %91[0, 0, 0] : f32 from vector<1x1x1xf32>
    %c5_i32 = arith.constant 5 : i32
    %93 = vector.broadcast %c5_i32 : i32 to vector<1x128xi32>
    %94 = arith.cmpi eq, %7, %93 : vector<1x128xi32>
    %cst_19 = arith.constant 0.000000e+00 : f32
    %95 = vector.broadcast %92 : f32 to vector<1x128xf32>
    %96 = vector.broadcast %cst_19 : f32 to vector<1x128xf32>
    %97 = arith.select %94, %95, %96 : vector<1x128xi1>, vector<1x128xf32>
    %98 = arith.addf %83, %97 : vector<1x128xf32>
    %99 = vector.extract_strided_slice %6 {offsets = [0, 6], sizes = [1, 1], strides = [1, 1]} : vector<1x8xf32> to vector<1x1xf32>
    %100 = vector.broadcast %99 : vector<1x1xf32> to vector<2x128xf32>
    %101 = arith.cmpf ole, %4, %100 : vector<2x128xf32>
    %102 = arith.extui %101 : vector<2x128xi1> to vector<2x128xi32>
    %103 = arith.sitofp %102 : vector<2x128xi32> to vector<2x128xf32>
    %104 = vector.shape_cast %103 : vector<2x128xf32> to vector<1x2x128xf32>
    %cst_20 = arith.constant dense<0.000000e+00> : vector<1xf32>
    %105 = vector.multi_reduction <add>, %104, %cst_20 [1, 2] : vector<1x2x128xf32> to vector<1xf32>
    %106 = vector.shape_cast %105 : vector<1xf32> to vector<1x1x1xf32>
    %107 = vector.extract %106[0, 0, 0] : f32 from vector<1x1x1xf32>
    %c6_i32 = arith.constant 6 : i32
    %108 = vector.broadcast %c6_i32 : i32 to vector<1x128xi32>
    %109 = arith.cmpi eq, %7, %108 : vector<1x128xi32>
    %cst_21 = arith.constant 0.000000e+00 : f32
    %110 = vector.broadcast %107 : f32 to vector<1x128xf32>
    %111 = vector.broadcast %cst_21 : f32 to vector<1x128xf32>
    %112 = arith.select %109, %110, %111 : vector<1x128xi1>, vector<1x128xf32>
    %113 = arith.addf %98, %112 : vector<1x128xf32>
    %114 = vector.extract_strided_slice %6 {offsets = [0, 7], sizes = [1, 1], strides = [1, 1]} : vector<1x8xf32> to vector<1x1xf32>
    %115 = vector.broadcast %114 : vector<1x1xf32> to vector<2x128xf32>
    %116 = arith.cmpf ole, %4, %115 : vector<2x128xf32>
    %117 = arith.extui %116 : vector<2x128xi1> to vector<2x128xi32>
    %118 = arith.sitofp %117 : vector<2x128xi32> to vector<2x128xf32>
    %119 = vector.shape_cast %118 : vector<2x128xf32> to vector<1x2x128xf32>
    %cst_22 = arith.constant dense<0.000000e+00> : vector<1xf32>
    %120 = vector.multi_reduction <add>, %119, %cst_22 [1, 2] : vector<1x2x128xf32> to vector<1xf32>
    %121 = vector.shape_cast %120 : vector<1xf32> to vector<1x1x1xf32>
    %122 = vector.extract %121[0, 0, 0] : f32 from vector<1x1x1xf32>
    %c7_i32 = arith.constant 7 : i32
    %123 = vector.broadcast %c7_i32 : i32 to vector<1x128xi32>
    %124 = arith.cmpi eq, %7, %123 : vector<1x128xi32>
    %cst_23 = arith.constant 0.000000e+00 : f32
    %125 = vector.broadcast %122 : f32 to vector<1x128xf32>
    %126 = vector.broadcast %cst_23 : f32 to vector<1x128xf32>
    %127 = arith.select %124, %125, %126 : vector<1x128xi1>, vector<1x128xf32>
    %128 = arith.addf %113, %127 : vector<1x128xf32>
    %c0_24 = arith.constant 0 : index
    %c0_25 = arith.constant 0 : index
    %c0_26 = arith.constant 0 : index
    %129 = vector.load %arg4[%c0_24, %c0_25, %c0_26] : memref<1x1x128xf32, #tpu.memory_space<vmem>>, vector<1x1x128xf32>
    %130 = vector.shape_cast %129 : vector<1x1x128xf32> to vector<1x128xf32>
    %131 = arith.addf %130, %128 : vector<1x128xf32>
    %c0_27 = arith.constant 0 : index
    %c0_28 = arith.constant 0 : index
    %c0_29 = arith.constant 0 : index
    %132 = vector.load %arg4[%c0_27, %c0_28, %c0_29] : memref<1x1x128xf32, #tpu.memory_space<vmem>>, vector<1x1x128xf32>
    %133 = vector.shape_cast %132 : vector<1x1x128xf32> to vector<1x128xf32>
    %134 = vector.shape_cast %131 : vector<1x128xf32> to vector<1x1x128xf32>
    tpu.vector_store %arg4[%c0_27, %c0_28, %c0_29], %134 {strides = array<i32>} : memref<1x1x128xf32, #tpu.memory_space<vmem>>, vector<1x1x128xf32>,
    return
  }
  func.func @transform_0(%arg0: i32, %arg1: i32) -> (i32, i32, i32) {
    %c0_i32 = arith.constant 0 : i32
    %c0_i32_0 = arith.constant 0 : i32
    %c0_i32_1 = arith.constant 0 : i32
    return %arg0, %c0_i32, %c0_i32_0 : i32, i32, i32
  }
  func.func @transform_1(%arg0: i32, %arg1: i32) -> (i32, i32, i32, i32) {
    %c1_i32 = arith.constant 1 : i32
    %c0_i32 = arith.constant 0 : i32
    %c0_i32_0 = arith.constant 0 : i32
    return %arg0, %c1_i32, %arg1, %c0_i32 : i32, i32, i32, i32
  }
  func.func @transform_2(%arg0: i32, %arg1: i32) -> (i32, i32, i32) {
    %c0_i32 = arith.constant 0 : i32
    %c0_i32_0 = arith.constant 0 : i32
    %c0_i32_1 = arith.constant 0 : i32
    return %arg0, %c0_i32, %c0_i32_0 : i32, i32, i32
  }
}

module attributes {stable_mosaic.version = 11 : i64} {
  func.func @_reduce_kernel(%arg0: i32, %arg1: i32, %arg2: memref<1x2x2x128xf32, #tpu.memory_space<vmem>>, %arg3: memref<1x1x1xf32, #tpu.memory_space<vmem>>, %arg4: memref<1x1x128xf32, #tpu.memory_space<vmem>>) attributes {dimension_semantics = [#tpu.dimension_semantics<parallel>, #tpu.dimension_semantics<arbitrary>], iteration_bounds = array<i64: 2, 1>, scalar_prefetch = 0 : i64, scratch_operands = 0 : i64, tpu.core_type = #tpu.core_type<tc>, window_params = [{transform_indices = @transform_0, window_bounds = array<i64: 1, 2, 2, 128>}, {transform_indices = @transform_1, window_bounds = array<i64: 1, 1, 1>}, {transform_indices = @transform_2, window_bounds = array<i64: 1, 1, 128>}]} {
    %c0_i32 = arith.constant 0 : i32
    %0 = arith.cmpi eq, %arg1, %c0_i32 : i32
    %1 = arith.extui %0 : i1 to i32
    %c0_i32_0 = arith.constant 0 : i32
    %2 = arith.cmpi ne, %1, %c0_i32_0 : i32
    scf.if %2 {
      %cst_21 = arith.constant 0.000000e+00 : f32
      %41 = vector.broadcast %cst_21 : f32 to vector<1x1x128xf32>
      %c0_22 = arith.constant 0 : index
      %c0_23 = arith.constant 0 : index
      %c0_24 = arith.constant 0 : index
      %42 = vector.load %arg4[%c0_22, %c0_23, %c0_24] : memref<1x1x128xf32, #tpu.memory_space<vmem>>, vector<1x1x128xf32>
      tpu.vector_store %arg4[%c0_22, %c0_23, %c0_24], %41 {strides = array<i32>} : memref<1x1x128xf32, #tpu.memory_space<vmem>>, vector<1x1x128xf32>,
    } else {
    }
    %c0 = arith.constant 0 : index
    %c0_1 = arith.constant 0 : index
    %c0_2 = arith.constant 0 : index
    %c0_3 = arith.constant 0 : index
    %3 = vector.load %arg2[%c0, %c0_1, %c0_2, %c0_3] : memref<1x2x2x128xf32, #tpu.memory_space<vmem>>, vector<1x1x2x128xf32>
    %4 = vector.shape_cast %3 : vector<1x1x2x128xf32> to vector<2x128xf32>
    %c0_4 = arith.constant 0 : index
    %c1 = arith.constant 1 : index
    %c0_5 = arith.constant 0 : index
    %c0_6 = arith.constant 0 : index
    %5 = vector.load %arg2[%c0_4, %c1, %c0_5, %c0_6] : memref<1x2x2x128xf32, #tpu.memory_space<vmem>>, vector<1x1x2x128xf32>
    %6 = vector.shape_cast %5 : vector<1x1x2x128xf32> to vector<2x128xf32>
    %c0_7 = arith.constant 0 : index
    %c0_8 = arith.constant 0 : index
    %c0_9 = arith.constant 0 : index
    %7 = vector.load %arg3[%c0_7, %c0_8, %c0_9] : memref<1x1x1xf32, #tpu.memory_space<vmem>>, vector<1x1x1xf32>
    %8 = vector.shape_cast %7 : vector<1x1x1xf32> to vector<1x1xf32>
    %9 = vector.broadcast %8 : vector<1x1xf32> to vector<2x128xf32>
    %10 = arith.cmpf olt, %6, %9 : vector<2x128xf32>
    %cst = arith.constant 0.000000e+00 : f32
    %11 = vector.broadcast %cst : f32 to vector<2x128xf32>
    %12 = arith.select %10, %4, %11 : vector<2x128xi1>, vector<2x128xf32>
    %13 = vector.shape_cast %12 : vector<2x128xf32> to vector<1x2x128xf32>
    %cst_10 = arith.constant dense<0.000000e+00> : vector<1xf32>
    %14 = vector.multi_reduction <add>, %13, %cst_10 [1, 2] : vector<1x2x128xf32> to vector<1xf32>
    %15 = vector.shape_cast %14 : vector<1xf32> to vector<1x1x1xf32>
    %16 = vector.extract %15[0, 0, 0] : f32 from vector<1x1x1xf32>
    %17 = arith.extui %10 : vector<2x128xi1> to vector<2x128xi32>
    %18 = arith.sitofp %17 : vector<2x128xi32> to vector<2x128xf32>
    %19 = vector.shape_cast %18 : vector<2x128xf32> to vector<1x2x128xf32>
    %cst_11 = arith.constant dense<0.000000e+00> : vector<1xf32>
    %20 = vector.multi_reduction <add>, %19, %cst_11 [1, 2] : vector<1x2x128xf32> to vector<1xf32>
    %21 = vector.shape_cast %20 : vector<1xf32> to vector<1x1x1xf32>
    %22 = vector.extract %21[0, 0, 0] : f32 from vector<1x1x1xf32>
    %23 = tpu.iota {dimensions = array<i32: 1>} : vector<1x128xi32>
    %c0_12 = arith.constant 0 : index
    %c0_13 = arith.constant 0 : index
    %c0_14 = arith.constant 0 : index
    %24 = vector.load %arg4[%c0_12, %c0_13, %c0_14] : memref<1x1x128xf32, #tpu.memory_space<vmem>>, vector<1x1x128xf32>
    %25 = vector.shape_cast %24 : vector<1x1x128xf32> to vector<1x128xf32>
    %c0_i32_15 = arith.constant 0 : i32
    %26 = vector.broadcast %c0_i32_15 : i32 to vector<1x128xi32>
    %27 = arith.cmpi eq, %23, %26 : vector<1x128xi32>
    %cst_16 = arith.constant 0.000000e+00 : f32
    %28 = vector.broadcast %16 : f32 to vector<1x128xf32>
    %29 = vector.broadcast %cst_16 : f32 to vector<1x128xf32>
    %30 = arith.select %27, %28, %29 : vector<1x128xi1>, vector<1x128xf32>
    %c1_i32 = arith.constant 1 : i32
    %31 = vector.broadcast %c1_i32 : i32 to vector<1x128xi32>
    %32 = arith.cmpi eq, %23, %31 : vector<1x128xi32>
    %cst_17 = arith.constant 0.000000e+00 : f32
    %33 = vector.broadcast %22 : f32 to vector<1x128xf32>
    %34 = vector.broadcast %cst_17 : f32 to vector<1x128xf32>
    %35 = arith.select %32, %33, %34 : vector<1x128xi1>, vector<1x128xf32>
    %36 = arith.addf %30, %35 : vector<1x128xf32>
    %37 = arith.addf %25, %36 : vector<1x128xf32>
    %c0_18 = arith.constant 0 : index
    %c0_19 = arith.constant 0 : index
    %c0_20 = arith.constant 0 : index
    %38 = vector.load %arg4[%c0_18, %c0_19, %c0_20] : memref<1x1x128xf32, #tpu.memory_space<vmem>>, vector<1x1x128xf32>
    %39 = vector.shape_cast %38 : vector<1x1x128xf32> to vector<1x128xf32>
    %40 = vector.shape_cast %37 : vector<1x128xf32> to vector<1x1x128xf32>
    tpu.vector_store %arg4[%c0_18, %c0_19, %c0_20], %40 {strides = array<i32>} : memref<1x1x128xf32, #tpu.memory_space<vmem>>, vector<1x1x128xf32>,
    return
  }
  func.func @transform_0(%arg0: i32, %arg1: i32) -> (i32, i32, i32, i32) {
    %c0_i32 = arith.constant 0 : i32
    %c0_i32_0 = arith.constant 0 : i32
    %c0_i32_1 = arith.constant 0 : i32
    return %arg0, %c0_i32, %arg1, %c0_i32_0 : i32, i32, i32, i32
  }
  func.func @transform_1(%arg0: i32, %arg1: i32) -> (i32, i32, i32) {
    %c0_i32 = arith.constant 0 : i32
    %c0_i32_0 = arith.constant 0 : i32
    %c0_i32_1 = arith.constant 0 : i32
    return %arg0, %c0_i32, %c0_i32_0 : i32, i32, i32
  }
  func.func @transform_2(%arg0: i32, %arg1: i32) -> (i32, i32, i32) {
    %c0_i32 = arith.constant 0 : i32
    %c0_i32_0 = arith.constant 0 : i32
    %c0_i32_1 = arith.constant 0 : i32
    return %arg0, %c0_i32, %c0_i32_0 : i32, i32, i32
  }
}

</mosaic_0001>

<bundles_post_ra>
// kernel: custom-call.4
= control target key start
LH: loop header
LB: loop body
LE: loop exit
PB: predicated region body
PF: predicated region fallthrough
CT: control target
= control target key end

     0   :  { %s6_s0 = inlined_call_operand.vmem [shape: s32[2], index: 0, kind: output, shape index: {}]  }

// kernel: ohem_cross_entropy_per_image.2
= control target key start
LH: loop header
LB: loop body
LE: loop exit
PB: predicated region body
PF: predicated region fallthrough
CT: control target
= control target key end

     0   :  { %s452_s9 = smov 0   ;;  %s454_s10 = smov 0   ;;  %s505_s0 = inlined_call_operand.vmem [shape: f32[2,4,2,128], index: 0, kind: input, shape index: {}]   ;;  %s506_s1 = inlined_call_operand.vmem [shape: s32[2,2,128], index: 1, kind: input, shape index: {}]   ;;  %s507_s2 = inlined_call_operand.vmem [shape: f32[2,2,2,128], index: 2, kind: output, shape index: {}]  }
   0x1   :  { %s456_s11 = smov 0  }
   0x2 LB: > { %s24_s12 = sadd.s32 1, %s431_s10  ;;  %p366_p0 = scmp.ge.s32.totalorder %s435_s11, 1  ;;  %s435_s11 = sphi %s456_s11, %s12_s11   ;;  %s431_s10 = sphi %s454_s10, %s509_s10   ;;  %s427_s9 = sphi %s452_s9, %s508_s9  }
   0x3   : > { %p26_p1 = scmp.ge.s32.totalorder %s24_s12, 2  ;;  %p145_p2 = scmp.lt.s32.totalorder %s435_s11, 3 }
   0x5   : > { %s511_s12 = smov (%p26_p1, %s24_s12), 0  ;;  %p146_p3 = pnand %p366_p0, %p145_p2 }
   0x6   : > { %p180_p4 = scmp.lt.s32.totalorder (!%p146_p3), %s427_s9, 1  ;;  %vm208_vm0 = vcmask (!%p146_p3), 1041408  }
   0x7   : > { %149 = sbr.rel (%p146_p3) target bundleno = 81 (0x51), region = 28 }
   0xe   : > { %s513_s9 = smov (!%p180_p4, %s427_s9), 1 }
   0xf   : > { %s375_s13 = sshll.u32 %s513_s9, 3  ;;  %s369_s17 = sshll.u32 %s513_s9, 1 }
  0x10   : > { %s187_s16 = scalar_lea.vmem %s505_s0, %s375_s13  ;;  %s194_s20 = scalar_lea.vmem %s506_s1, %s369_s17 }
  0x11   : > { %v203_v0 = vld [vmem:[%s187_s16] sm:$0x3]  ;;  %v204_v1 = vld [vmem:[%s187_s16 + $0x2] sm:$0x3]  ;;  %v205_v2 = vld [vmem:[%s187_s16 + $0x4] sm:$0x3] }
  0x12   : > { %v206_v3 = vld [vmem:[%s187_s16 + $0x6] sm:$0x3]  ;;  %v209_v4 = vsel %vm208_vm0, %v203_v0, -inf  ;;  %v210_v5 = vsel %vm208_vm0, %v204_v1, -inf  ;;  %v211_v6 = vsel %vm208_vm0, %v205_v2, -inf  ;;  %s376_s21 = sshll.u32 %s513_s9, 2 }
  0x13   : > { %v212_v7 = vsel %vm208_vm0, %v206_v3, -inf  ;;  %v213_v8 = vmax.f32 %v209_v4, %v210_v5  ;;  %v207_v19 = vld [vmem:[%s194_s20] sm:$0x3]  ;;  %s202_s24 = scalar_lea.vmem %s507_s2, %s376_s21 }
  0x14   : > { %v214_v9 = vmax.f32 %v211_v6, %v212_v7  ;;  %vm238_vm1 = vcmp.eq.s32.totalorder %v207_v19, 4294967295  ;;  %vm259_vm6 = vcmp.ne.s32.totalorder %v207_v19, 4294967295 }
  0x15   : > { %v239_v21 = vsel %vm238_vm1, 0, %v207_v19 }
  0x16   : > { %v215_v10 = vmax.f32 %v213_v8, %v214_v9  ;;  %vm240_vm2 = vcmp.eq.s32.totalorder %v239_v21, 0  ;;  %vm241_vm3 = vcmp.eq.s32.totalorder %v239_v21, 1  ;;  %vm242_vm4 = vcmp.eq.s32.totalorder %v239_v21, 2 }
  0x17   : > { %v244_v31 = vsel %vm240_vm2, %v203_v0, 0.0  ;;  %v245_v32 = vsel %vm241_vm3, %v204_v1, 0.0  ;;  %v246_v36 = vsel %vm242_vm4, %v205_v2, 0.0  ;;  %vm243_vm5 = vcmp.eq.s32.totalorder %v239_v21, 3 }
  0x18   : > { %v216_v11 = vsub.f32 %v203_v0, %v215_v10  ;;  %v217_v12 = vsub.f32 %v204_v1, %v215_v10  ;;  %v218_v13 = vsub.f32 %v205_v2, %v215_v10  ;;  %v219_v14 = vsub.f32 %v206_v3, %v215_v10 }
  0x19   : > { %v248_v34 = vsel %vm208_vm0, %v244_v31, 0.0  ;;  %v249_v35 = vsel %vm208_vm0, %v245_v32, 0.0  ;;  %v251_v38 = vsel %vm208_vm0, %v246_v36, 0.0  ;;  %v247_v39 = vsel %vm243_vm5, %v206_v3, 0.0 }
  0x1a   : > { %v220_v15 = vmul.f32 1.442695, %v216_v11  ;;  %v222_v16 = vmul.f32 1.442695, %v217_v12  ;;  %v224_v17 = vmul.f32 1.442695, %v218_v13  ;;  %v250_v37 = vadd.f32 %v249_v35, %v248_v34 }
  0x1b   : > { %v226_v18 = vmul.f32 1.442695, %v219_v14  ;;  %v253_v41 = vsel %vm208_vm0, %v247_v39, 0.0 }
  0x1c   : > { %401 = vpow2.f32 %v220_v15  ;;  %v252_v40 = vadd.f32 %v251_v38, %v250_v37 }
  0x1d   : > { %403 = vpow2.f32 %v222_v16 }
  0x1e   : > { %405 = vpow2.f32 %v224_v17  ;;  %v254_v44 = vadd.f32 %v253_v41, %v252_v40 }
  0x1f   : > { %407 = vpow2.f32 %v226_v18 }
  0x26   : > { %v402_v20 = vpop.eup %401 }
  0x27   : > { %v404_v22 = vpop.eup %403  ;;  %v228_v23 = vsel %vm208_vm0, %v402_v20, 0.0 }
  0x28   : > { %v406_v24 = vpop.eup %405  ;;  %v229_v25 = vsel %vm208_vm0, %v404_v22, 0.0 }
  0x29   : > { %v408_v26 = vpop.eup %407  ;;  %v230_v27 = vadd.f32 %v229_v25, %v228_v23  ;;  %v231_v28 = vsel %vm208_vm0, %v406_v24, 0.0 }
  0x2a   : > { %v233_v29 = vsel %vm208_vm0, %v408_v26, 0.0 }
  0x2b   : > { %v232_v30 = vadd.f32 %v231_v28, %v230_v27 }
  0x2d   : > { %v234_v33 = vadd.f32 %v233_v29, %v232_v30 }
  0x2f   : > { %409 = vlog2.f32 %v234_v33 }
  0x39   : > { %v410_v42 = vpop.eup %409 }
  0x3a   : > { %v236_v43 = vmul.f32 0.6931472, %v410_v42 }
  0x3c   : > { %v237_v45 = vadd.f32 %v236_v43, %v215_v10 }
  0x3e   : > { %v255_v46 = vsub.f32 %v237_v45, %v254_v44 }
  0x40   : > { %v256_v47 = vsub.f32 0.0, %v255_v46  ;;  %260 = vst [vmem:[%s202_s24] sm:$0x3] %v255_v46 }
  0x42   : > { %v257_v48 = vmul.f32 1.442695, %v256_v47 }
  0x44   : > { %411 = vpow2.f32 %v257_v48 }
  0x4e   : > { %v412_v49 = vpop.eup %411 }
  0x4f   : > { %v261_v50 = vsel %vm259_vm6, %v412_v49, inf }
  0x50   : > { %372 = vst [vmem:[%s202_s24 + $0x2] sm:$0x3] %v261_v50 }
  0x51 PF: > { %s12_s11 = sadd.s32 1, %s435_s11   ;;  %s508_s9 = smov %s431_s10 }
  0x52   : > { %p9_p5 = scmp.ge.s32.totalorder %s12_s11, 4   ;;  %s509_s10 = smov %s511_s12 }
  0x54   :  { %11 = sbr.rel (!%p9_p5) target bundleno = 2 (0x2), region = 62 }

// kernel: closed_call.11
= control target key start
LH: loop header
LB: loop body
LE: loop exit
PB: predicated region body
PF: predicated region fallthrough
CT: control target
= control target key end

     0   :  { %s565_s9 = smov 0   ;;  %s567_s10 = smov 0   ;;  %s619_s0 = inlined_call_operand.vmem [shape: f32[2,1,8], index: 0, kind: input, shape index: {}]   ;;  %s620_s1 = inlined_call_operand.vmem [shape: f32[2,2,2,128], index: 1, kind: input, shape index: {}]   ;;  %s621_s2 = inlined_call_operand.vmem [shape: f32[2,1,128], index: 2, kind: output, shape index: {}]  }
   0x1   :  { %s569_s11 = smov 0  }
   0x2 LB: > { %s24_s12 = sadd.s32 1, %s535_s10  ;;  %p443_p0 = scmp.ge.s32.totalorder %s539_s11, 1  ;;  %s539_s11 = sphi %s569_s11, %s12_s11   ;;  %s535_s10 = sphi %s567_s10, %s623_s10   ;;  %s531_s9 = sphi %s565_s9, %s622_s9  }
   0x3   : > { %p26_p1 = scmp.ge.s32.totalorder %s24_s12, 2  ;;  %p138_p2 = scmp.lt.s32.totalorder %s539_s11, 3 }
   0x5   : > { %s625_s12 = smov (%p26_p1, %s24_s12), 0  ;;  %p139_p3 = pnand %p443_p0, %p138_p2 }
   0x6   : > { %p165_p4 = scmp.lt.s32.totalorder (!%p139_p3), %s531_s9, 1  ;;  %v541_v0 = vmov (!%p139_p3), 1   ;;  %v542_v1 = vmov (!%p139_p3), 0   ;;  %v543_v3 = vmov (!%p139_p3), 3   ;;  %v544_v4 = vmov (!%p139_p3), 2  }
   0x7   : > { %142 = sbr.rel (%p139_p3) target bundleno = 384 (0x180), region = 28  ;;  %509 = vset.pattern.permute.xlu1 (!%p139_p3), %v541_v0  ;;  %508 = vset.pattern.permute.xlu0 (!%p139_p3), %v542_v1  ;;  %v545_v5 = vmov (!%p139_p3), 4   ;;  %v546_v6 = vmov (!%p139_p3), 7   ;;  %v547_v7 = vmov (!%p139_p3), 5   ;;  %v548_v8 = vmov (!%p139_p3), 6  }
   0x8   : > { %vm201_vm0 = vcmask (!%p139_p3), 1041408   ;;  %v549_v12 = vmov (!%p139_p3), 0.0  }
   0xe   : > { %s627_s9 = smov (!%p165_p4, %s531_s9), 1 }
   0xf   : > { %s167_s15 = scalar_lea.vmem %s619_s0, %s627_s9  ;;  %s458_s16 = sshll.u32 %s627_s9, 2 }
  0x10   : > { %v447_v2 = vld [vmem:[%s167_s15] ss:$0 sm:$0xff]  ;;  %s400_s19 = scalar_lea.vmem %s620_s1, %s458_s16  ;;  %s605_s22 = scalar_lea.vmem %s621_s2, %s627_s9 }
  0x11   : > { %217 = vperm.xlu1 %509, %v447_v2   ;;  %195 = vperm.xlu0 %508, %v447_v2   ;;  %v446_v9 = vld [vmem:[%s400_s19 + $0x2] sm:$0x3]  ;;  %184 = vst [vmem:[%s605_s22] sm:$0x1] %v549_v12 }
  0x15   : > { %511 = vset.pattern.permute.xlu1 %v543_v3  ;;  %510 = vset.pattern.permute.xlu0 %v544_v4 }
  0x16   : > { %259 = vperm.xlu1 %511, %v447_v2   ;;  %238 = vperm.xlu0 %510, %v447_v2  }
  0x1a   : > { %512 = vset.pattern.permute.xlu1 %v545_v5  ;;  %516 = vset.pattern.permute.xlu0 %v546_v6 }
  0x1b   : > { %280 = vperm.xlu1 %512, %v447_v2  }
  0x1f   : > { %513 = vset.pattern.permute.xlu1 %v547_v7 }
  0x20   : > { %301 = vperm.xlu1 %513, %v447_v2  }
  0x24   : > { %514 = vset.pattern.permute.xlu1 %v548_v8 }
  0x25   : > { %322 = vperm.xlu1 %514, %v447_v2  }
  0x29   : > { %515 = vset.pattern.permute.xlu1 %v546_v6 }
  0x2a   : > { %343 = vperm.xlu1 %515, %v447_v2  }
  0x90   : > { %v218_v10 = vpop.permute.xlu1 %217  ;;  %v196_v11 = vpop.permute.xlu0 %195 }
  0x91   : > { %vm220_vm1 = vcmp.le.f32.partialorder %v446_v9, %v218_v10  ;;  %vm198_vm2 = vcmp.le.f32.partialorder %v446_v9, %v196_v11 }
  0x92   : > { %v449_v13 = vsel %vm220_vm1, 1.0, %v549_v12  ;;  %v448_v14 = vsel %vm198_vm2, 1.0, %v549_v12 }
  0x93   : > { %v223_v15 = vsel %vm201_vm0, %v449_v13, 0.0  ;;  %v202_v16 = vsel %vm201_vm0, %v448_v14, 0.0 }
  0x94   : > { %224 = vadd.xlane.f32.xlu1 %v223_v15  ;;  %203 = vadd.xlane.f32.xlu0 %v202_v16 }
  0x95   : > { %v260_v17 = vpop.permute.xlu1 %259  ;;  %v239_v18 = vpop.permute.xlu0 %238 }
  0x96   : > { %vm262_vm3 = vcmp.le.f32.partialorder %v446_v9, %v260_v17  ;;  %vm241_vm4 = vcmp.le.f32.partialorder %v446_v9, %v239_v18 }
  0x97   : > { %v451_v19 = vsel %vm262_vm3, 1.0, %v549_v12  ;;  %v450_v20 = vsel %vm241_vm4, 1.0, %v549_v12 }
  0x98   : > { %v265_v21 = vsel %vm201_vm0, %v451_v19, 0.0  ;;  %v244_v22 = vsel %vm201_vm0, %v450_v20, 0.0 }
  0x99   : > { %266 = vadd.xlane.f32.xlu0 %v265_v21  ;;  %245 = vadd.xlane.f32.xlu1 %v244_v22 }
  0x9a   : > { %v281_v23 = vpop.permute.xlu1 %280 }
  0x9b   : > { %vm283_vm5 = vcmp.le.f32.partialorder %v446_v9, %v281_v23 }
  0x9c   : > { %v452_v24 = vsel %vm283_vm5, 1.0, %v549_v12 }
  0x9d   : > { %v286_v25 = vsel %vm201_vm0, %v452_v24, 0.0 }
  0x9e   : > { %287 = vadd.xlane.f32.xlu1 %v286_v25 }
  0x9f   : > { %v302_v26 = vpop.permute.xlu1 %301 }
  0xa0   : > { %vm304_vm6 = vcmp.le.f32.partialorder %v446_v9, %v302_v26 }
  0xa1   : > { %v453_v27 = vsel %vm304_vm6, 1.0, %v549_v12 }
  0xa2   : > { %v307_v28 = vsel %vm201_vm0, %v453_v27, 0.0  ;;  %v187_v27 = vlaneseq }
  0xa3   : > { %308 = vadd.xlane.f32.xlu0 %v307_v28 }
  0xa4   : > { %v323_v29 = vpop.permute.xlu1 %322  ;;  %v188_v28 = vand.u32 127, %v187_v27 }
  0xa5   : > { %vm325_vm7 = vcmp.le.f32.partialorder %v446_v9, %v323_v29 }
  0xa6   : > { %v454_v30 = vsel %vm325_vm7, 1.0, %v549_v12  ;;  %vm212_vm9 = vcmp.eq.s32.totalorder %v188_v28, 0  ;;  %vm233_vm10 = vcmp.eq.s32.totalorder %v188_v28, 1  ;;  %vm254_vm11 = vcmp.eq.s32.totalorder %v188_v28, 2 }
  0xa7   : > { %v328_v31 = vsel %vm201_vm0, %v454_v30, 0.0  ;;  %vm275_vm12 = vcmp.eq.s32.totalorder %v188_v28, 3  ;;  %vm296_vm13 = vcmp.eq.s32.totalorder %v188_v28, 4  ;;  %vm317_vm14 = vcmp.eq.s32.totalorder %v188_v28, 5 }
  0xa8   : > { %329 = vadd.xlane.f32.xlu1 %v328_v31  ;;  %vm338_vm15 = vcmp.eq.s32.totalorder %v188_v28, 6 }
  0xa9   : > { %v344_v32 = vpop.permute.xlu1 %343 }
  0xaa   : > { %vm346_vm8 = vcmp.le.f32.partialorder %v446_v9, %v344_v32 }
  0xab   : > { %v455_v33 = vsel %vm346_vm8, 1.0, %v549_v12 }
  0xac   : > { %v349_v34 = vsel %vm201_vm0, %v455_v33, 0.0  ;;  %vm359_vm0 = vcmp.eq.s32.totalorder %v188_v28, 7 }
  0xad   : > { %350 = vadd.xlane.f32.xlu0 %v349_v34 }
 0x121   : > { %v225_v35 = vpop.xlane.xlu1 %224  ;;  %v204_v36 = vpop.xlane.xlu0 %203 }
 0x122   : > { %v226_v37 = vrot.slane %v225_v35, 4  ;;  %v205_v38 = vrot.slane %v204_v36, 4 }
 0x124   : > { %v227_v39 = vadd.f32 %v226_v37, %v225_v35  ;;  %v206_v40 = vadd.f32 %v205_v38, %v204_v36 }
 0x126   : > { %v228_v41 = vrot.slane %v227_v39, 2  ;;  %v207_v42 = vrot.slane %v206_v40, 2  ;;  %v246_v43 = vpop.xlane.xlu1 %245  ;;  %v267_v44 = vpop.xlane.xlu0 %266 }
 0x127   : > { %v247_v45 = vrot.slane %v246_v43, 4  ;;  %v268_v46 = vrot.slane %v267_v44, 4 }
 0x128   : > { %v208_v47 = vadd.f32 %v207_v42, %v206_v40  ;;  %v229_v48 = vadd.f32 %v228_v41, %v227_v39 }
 0x129   : > { %v248_v49 = vadd.f32 %v247_v45, %v246_v43  ;;  %v269_v50 = vadd.f32 %v268_v46, %v267_v44 }
 0x12a   : > { %v209_v51 = vrot.slane %v208_v47, 1  ;;  %v230_v52 = vrot.slane %v229_v48, 1 }
 0x12b   : > { %v249_v53 = vrot.slane %v248_v49, 2  ;;  %v270_v54 = vrot.slane %v269_v50, 2  ;;  %v288_v55 = vpop.xlane.xlu1 %287 }
 0x12c   : > { %v289_v56 = vrot.slane %v288_v55, 4  ;;  %v210_v57 = vadd.f32 %v209_v51, %v208_v47  ;;  %v231_v58 = vadd.f32 %v230_v52, %v229_v48  ;;  %v363_v51 = vld [vmem:[%s605_s22] sm:$0x1] }
 0x12d   : > { %v250_v59 = vadd.f32 %v249_v53, %v248_v49  ;;  %v271_v60 = vadd.f32 %v270_v54, %v269_v50 }
 0x12e   : > { %v290_v61 = vadd.f32 %v289_v56, %v288_v55  ;;  %459 = vpush %v210_v57 }
 0x12f   : > { %461 = vpush %v231_v58  ;;  %v251_v62 = vrot.slane %v250_v59, 1  ;;  %v272_v63 = vrot.slane %v271_v60, 1 }
 0x130   : > { %v291_v0 = vrot.slane %v290_v61, 2  ;;  %v309_v1 = vpop.xlane.xlu0 %308 }
 0x131   : > { %v310_v2 = vrot.slane %v309_v1, 4  ;;  %v252_v3 = vadd.f32 %v251_v62, %v250_v59  ;;  %v273_v4 = vadd.f32 %v272_v63, %v271_v60 }
 0x132   : > { %v292_v5 = vadd.f32 %v291_v0, %v290_v61 }
 0x133   : > { %v311_v6 = vadd.f32 %v310_v2, %v309_v1  ;;  %463 = vpush %v252_v3 }
 0x134   : > { %465 = vpush %v273_v4  ;;  %v293_v7 = vrot.slane %v292_v5, 1 }
 0x135   : > { %v312_v8 = vrot.slane %v311_v6, 2  ;;  %v330_v9 = vpop.xlane.xlu1 %329 }
 0x136   : > { %v331_v10 = vrot.slane %v330_v9, 4  ;;  %v294_v11 = vadd.f32 %v293_v7, %v292_v5 }
 0x137   : > { %v313_v12 = vadd.f32 %v312_v8, %v311_v6 }
 0x138   : > { %v332_v13 = vadd.f32 %v331_v10, %v330_v9  ;;  %467 = vpush %v294_v11 }
 0x139   : > { %v314_v14 = vrot.slane %v313_v12, 1 }
 0x13a   : > { %v333_v15 = vrot.slane %v332_v13, 2  ;;  %v351_v16 = vpop.xlane.xlu0 %350 }
 0x13b   : > { %v352_v17 = vrot.slane %v351_v16, 4  ;;  %v315_v18 = vadd.f32 %v314_v14, %v313_v12 }
 0x13c   : > { %v334_v19 = vadd.f32 %v333_v15, %v332_v13 }
 0x13d   : > { %v353_v20 = vadd.f32 %v352_v17, %v351_v16  ;;  %469 = vpush %v315_v18 }
 0x13e   : > { %v335_v21 = vrot.slane %v334_v19, 1 }
 0x13f   : > { %v354_v22 = vrot.slane %v353_v20, 2 }
 0x140   : > { %v336_v23 = vadd.f32 %v335_v21, %v334_v19 }
 0x141   : > { %v355_v24 = vadd.f32 %v354_v22, %v353_v20 }
 0x142   : > { %471 = vpush %v336_v23 }
 0x143   : > { %v356_v25 = vrot.slane %v355_v24, 1 }
 0x145   : > { %v357_v26 = vadd.f32 %v356_v25, %v355_v24 }
 0x147   : > { %473 = vpush %v357_v26 }
 0x15f   : > { %s460_s23 = spop %459 }
 0x160   : > { %s462_s24 = spop %461  ;;  %v213_v29 = vstv %s460_s23 }
 0x161   : > { %v234_v30 = vstv %s462_s24  ;;  %v214_v32 = vsel %vm212_vm9, %v213_v29, 0.0 }
 0x162   : > { %v235_v33 = vsel %vm233_vm10, %v234_v30, 0.0 }
 0x163   : > { %v236_v35 = vadd.f32 %v235_v33, %v214_v32 }
 0x164   : > { %s464_s25 = spop %463 }
 0x165   : > { %v255_v31 = vstv %s464_s25  ;;  %s466_s26 = spop %465 }
 0x166   : > { %v256_v34 = vsel %vm254_vm11, %v255_v31, 0.0  ;;  %v276_v37 = vstv %s466_s26 }
 0x167   : > { %v257_v36 = vadd.f32 %v256_v34, %v236_v35  ;;  %v277_v39 = vsel %vm275_vm12, %v276_v37, 0.0 }
 0x169   : > { %s468_s27 = spop %467  ;;  %v278_v40 = vadd.f32 %v277_v39, %v257_v36 }
 0x16a   : > { %v297_v38 = vstv %s468_s27 }
 0x16b   : > { %v298_v42 = vsel %vm296_vm13, %v297_v38, 0.0 }
 0x16c   : > { %v299_v45 = vadd.f32 %v298_v42, %v278_v40 }
 0x16e   : > { %s470_s28 = spop %469 }
 0x16f   : > { %v318_v41 = vstv %s470_s28 }
 0x170   : > { %v319_v43 = vsel %vm317_vm14, %v318_v41, 0.0 }
 0x171   : > { %v320_v47 = vadd.f32 %v319_v43, %v299_v45 }
 0x173   : > { %s472_s29 = spop %471 }
 0x174   : > { %v339_v44 = vstv %s472_s29 }
 0x175   : > { %v340_v46 = vsel %vm338_vm15, %v339_v44, 0.0 }
 0x176   : > { %v341_v48 = vadd.f32 %v340_v46, %v320_v47 }
 0x178   : > { %s474_s30 = spop %473 }
 0x179   : > { %v360_v49 = vstv %s474_s30 }
 0x17a   : > { %v361_v50 = vsel %vm359_vm0, %v360_v49, 0.0 }
 0x17b   : > { %v362_v52 = vadd.f32 %v361_v50, %v341_v48 }
 0x17d   : > { %v364_v53 = vadd.f32 %v363_v51, %v362_v52 }
 0x17f   : > { %365 = vst [vmem:[%s605_s22] sm:$0x1] %v364_v53 }
 0x180 PF: > { %s12_s11 = sadd.s32 1, %s539_s11   ;;  %s622_s9 = smov %s535_s10 }
 0x181   : > { %p9_p5 = scmp.ge.s32.totalorder %s12_s11, 4   ;;  %s623_s10 = smov %s625_s12 }
 0x183   :  { %11 = sbr.rel (!%p9_p5) target bundleno = 2 (0x2), region = 65 }

// kernel: ohem_cross_entropy_per_image.3
= control target key start
LH: loop header
LB: loop body
LE: loop exit
PB: predicated region body
PF: predicated region fallthrough
CT: control target
= control target key end

     0   :  { %s387_s9 = smov 0   ;;  %s389_s10 = smov 0   ;;  %s428_s0 = inlined_call_operand.vmem [shape: f32[2,2,2,128], index: 0, kind: input, shape index: {}]   ;;  %s429_s1 = inlined_call_operand.vmem [shape: f32[2,1,1], index: 1, kind: input, shape index: {}]   ;;  %s430_s2 = inlined_call_operand.vmem [shape: f32[2,1,128], index: 2, kind: output, shape index: {}]  }
   0x1   :  { %s391_s11 = smov 0  }
   0x2 LB: > { %s24_s12 = sadd.s32 1, %s364_s10  ;;  %p306_p0 = scmp.ge.s32.totalorder %s368_s11, 1  ;;  %s368_s11 = sphi %s391_s11, %s12_s11   ;;  %s364_s10 = sphi %s389_s10, %s432_s10   ;;  %s360_s9 = sphi %s387_s9, %s431_s9  }
   0x3   : > { %p26_p1 = scmp.ge.s32.totalorder %s24_s12, 2  ;;  %p137_p2 = scmp.lt.s32.totalorder %s368_s11, 3 }
   0x5   : > { %s434_s12 = smov (%p26_p1, %s24_s12), 0  ;;  %p138_p3 = pnand %p306_p0, %p137_p2 }
   0x6   : > { %p163_p4 = scmp.lt.s32.totalorder (!%p138_p3), %s360_s9, 1  ;;  %v370_v0 = vmov (!%p138_p3), 0   ;;  %v371_v2 = vmov (!%p138_p3), 0.0   ;;  %vm197_vm0 = vcmask (!%p138_p3), 1041408   ;;  %v220_v24 = vlaneseq (!%p138_p3) }
   0x7   : > { %141 = sbr.rel (%p138_p3) target bundleno = 360 (0x168), region = 28  ;;  %345 = vset.pattern.permute.xlu0 (!%p138_p3), %v370_v0 }
   0x8   : > { %v221_v25 = vand.u32 (!%p138_p3), 127, %v220_v24 }
   0xa   : > { %vm223_vm2 = vcmp.eq.s32.totalorder (!%p138_p3), %v221_v25, 0  ;;  %vm226_vm3 = vcmp.eq.s32.totalorder (!%p138_p3), %v221_v25, 1 }
   0xe   : > { %s436_s9 = smov (!%p163_p4, %s360_s9), 1 }
   0xf   : > { %s173_s15 = scalar_lea.vmem %s429_s1, %s436_s9  ;;  %s411_s18 = scalar_lea.vmem %s430_s2, %s436_s9 }
  0x10   : > { %v310_v1 = vld [vmem:[%s173_s15] ss:$0 sm:$0xff]  ;;  %181 = vst [vmem:[%s411_s18] sm:$0x1] %v371_v2  ;;  %s314_s19 = sshll.u32 %s436_s9, 2 }
  0x11   : > { %192 = vperm.xlu0 %345, %v310_v1   ;;  %s170_s22 = scalar_lea.vmem %s428_s0, %s314_s19 }
  0x12   : > { %v309_v3 = vld [vmem:[%s170_s22 + $0x2] sm:$0x3]  ;;  %v182_v4 = vld [vmem:[%s170_s22] sm:$0x3] }
  0x17   : > { %v222_v29 = vld [vmem:[%s411_s18] sm:$0x1] }
  0x90   : > { %v193_v5 = vpop.permute.xlu0 %192 }
  0x91   : > { %vm195_vm1 = vcmp.lt.f32.partialorder %v309_v3, %v193_v5 }
  0x92   : > { %v311_v6 = vsel %vm195_vm1, 1.0, %v371_v2  ;;  %v196_v7 = vsel %vm195_vm1, %v182_v4, 0.0 }
  0x93   : > { %v210_v8 = vsel %vm197_vm0, %v311_v6, 0.0  ;;  %v198_v9 = vsel %vm197_vm0, %v196_v7, 0.0 }
  0x94   : > { %211 = vadd.xlane.f32.xlu1 %v210_v8  ;;  %199 = vadd.xlane.f32.xlu0 %v198_v9 }
 0x121   : > { %v212_v10 = vpop.xlane.xlu1 %211  ;;  %v200_v11 = vpop.xlane.xlu0 %199 }
 0x122   : > { %v213_v12 = vrot.slane %v212_v10, 4  ;;  %v201_v13 = vrot.slane %v200_v11, 4 }
 0x124   : > { %v214_v14 = vadd.f32 %v213_v12, %v212_v10  ;;  %v202_v15 = vadd.f32 %v201_v13, %v200_v11 }
 0x126   : > { %v215_v16 = vrot.slane %v214_v14, 2  ;;  %v203_v17 = vrot.slane %v202_v15, 2 }
 0x128   : > { %v216_v18 = vadd.f32 %v215_v16, %v214_v14  ;;  %v204_v19 = vadd.f32 %v203_v17, %v202_v15 }
 0x12a   : > { %v205_v20 = vrot.slane %v204_v19, 1  ;;  %v217_v21 = vrot.slane %v216_v18, 1 }
 0x12c   : > { %v206_v22 = vadd.f32 %v205_v20, %v204_v19  ;;  %v218_v23 = vadd.f32 %v217_v21, %v216_v18 }
 0x12e   : > { %315 = vpush %v206_v22 }
 0x12f   : > { %317 = vpush %v218_v23 }
 0x15f   : > { %s316_s23 = spop %315 }
 0x160   : > { %v224_v26 = vstv %s316_s23  ;;  %s318_s24 = spop %317 }
 0x161   : > { %v225_v27 = vsel %vm223_vm2, %v224_v26, 0.0  ;;  %v227_v28 = vstv %s318_s24 }
 0x162   : > { %v228_v30 = vsel %vm226_vm3, %v227_v28, 0.0 }
 0x163   : > { %v229_v31 = vadd.f32 %v228_v30, %v225_v27 }
 0x165   : > { %v230_v32 = vadd.f32 %v229_v31, %v222_v29 }
 0x167   : > { %231 = vst [vmem:[%s411_s18] sm:$0x1] %v230_v32 }
 0x168 PF: > { %s12_s11 = sadd.s32 1, %s368_s11   ;;  %s431_s9 = smov %s364_s10 }
 0x169   : > { %p9_p5 = scmp.ge.s32.totalorder %s12_s11, 4   ;;  %s432_s10 = smov %s434_s12 }
 0x16b   :  { %11 = sbr.rel (!%p9_p5) target bundleno = 2 (0x2), region = 66 }

</bundles_post_ra>
